<compile_context>
chip_gen: v7x
topology: tpu7x:2x2x1
jax: 0.10.0
libtpu: 0.0.40
codegen_flags: <defaults>
</compile_context>

<pallas_src>
import math

import jax
import jax.numpy as jnp
from jax.experimental import pallas as pl
from jax.experimental.pallas import tpu as pltpu


# ----------------------------------------------------------------------------
# Fast path: embedding table resident in VMEM, gather via dynamic VMEM reads.
# ----------------------------------------------------------------------------
def _vmem_gather_kernel(ids_ref, emb_ref, pe_ref, out_ref, gathered):
    """One grid step = (seq chunk j, batch b) -> (rows, D) output slab.

    ids_ref : SMEM (B*S,) int32     flattened token ids (scalar prefetch)
    emb_ref : VMEM (V, D) f32       full table, resident (constant block index)
    pe_ref  : VMEM (rows, D) f32    positional encodings for this chunk
    out_ref : VMEM (1, rows, D) f32 output block
    gathered: VMEM (rows, D) f32    gathered embedding rows
    """
    j = pl.program_id(0)
    b = pl.program_id(1)
    rows = pe_ref.shape[0]
    V = emb_ref.shape[0]
    S = rows * pl.num_programs(0)
    base = b * S + j * rows

    # Static unroll over rows: SMEM scalar read + dynamic-sublane VMEM load.
    for r in range(rows):
        tok = jnp.clip(ids_ref[base + r], 0, V - 1)  # guard OOB ids
        gathered[pl.ds(r, 1), :] = emb_ref[pl.ds(tok, 1), :]

    # One big VPU add + one lane-dense store.
    out_ref[0] = (gathered[...] + pe_ref[...]).astype(out_ref.dtype)


# ----------------------------------------------------------------------------
# HBM path: table in HBM, per-row gather DMAs double-buffered across steps.
# ----------------------------------------------------------------------------
def _hbm_gather_kernel(ids_ref, emb_hbm, pe_ref, out_ref, gathered, sems):
    """gathered: VMEM (2, rows, D) f32; sems: DMA semaphores (2,)."""
    j = pl.program_id(0)
    b = pl.program_id(1)
    nj = pl.num_programs(0)
    nb = pl.num_programs(1)
    rows = pe_ref.shape[0]
    V = emb_hbm.shape[0]
    S = rows * nj

    t = j * nb + b          # linear step index (b is the fastest axis)
    slot = t % 2

    def issue(jj, bb, sl):
        base = bb * S + jj * rows
        for r in range(rows):
            tok = jnp.clip(ids_ref[base + r], 0, V - 1)
            pltpu.make_async_copy(
                emb_hbm.at[pl.ds(tok, 1), :],
                gathered.at[sl, pl.ds(r, 1), :],
                sems.at[sl],
            ).start()

    # Prime the pipeline on the very first step.
    @pl.when(t == 0)
    def _():
        issue(j, b, slot)

    # Issue next chunk's row DMAs (and its SMEM id reads) BEFORE waiting on
    # the current chunk, so the HBM round-trip overlaps this step's compute.
    @pl.when(t + 1 < nj * nb)
    def _():
        b_next = (b + 1) % nb
        j_next = j + (b + 1) // nb
        issue(j_next, b_next, 1 - slot)

    # Single aggregate wait: all `rows` copies signalled sems[slot]; one
    # descriptor covering (rows, D) bytes waits for the lot.
    pltpu.make_async_copy(
        emb_hbm.at[pl.ds(0, rows), :],
        gathered.at[slot],
        sems.at[slot],
    ).wait()

    out_ref[0] = (gathered[slot] + pe_ref[...]).astype(out_ref.dtype)


# ----------------------------------------------------------------------------
# Host-side helpers / wrapper
# ----------------------------------------------------------------------------
def make_positional_encoding(max_len, d_model):
    """Same formula as PositionalEncoding.__init__ (sin on even, cos on odd)."""
    assert d_model % 2 == 0, "PositionalEncoding requires an even d_model"
    position = jnp.arange(max_len, dtype=jnp.float32)[:, None]            # (L, 1)
    div_term = jnp.exp(
        jnp.arange(0, d_model, 2, dtype=jnp.float32)
        * (-math.log(10000.0) / d_model))
    pe = jnp.zeros((max_len, d_model), jnp.float32)
    pe = pe.at[:, 0::2].set(jnp.sin(position * div_term))
    pe = pe.at[:, 1::2].set(jnp.cos(position * div_term))
    return pe                                                             # (L, D)


def _pick_seq_chunk(seq_len, max_chunk=256):
    """Rows of output produced per grid step.

    Must divide seq_len and (unless it equals seq_len) be a multiple of 8 so
    (rows, D) blocks respect the (8, 128) tiling constraint.  Large by default:
    bigger slabs amortize the ~0.35 us per-grid-step overhead (v5e/v6e have a
    single TensorCore, so many small "parallel" steps buy nothing).
    """
    if seq_len <= max_chunk:
        return seq_len
    c = (max_chunk // 8) * 8
    while c >= 8:
        if seq_len % c == 0:
            return c
        c -= 8
    return seq_len  # fallback: one chunk = full sequence (always legal)


def text_embedder(ids, emb_table, pe_full, *, max_seq_chunk=256,
                  vmem_budget_bytes=24 << 20):
    """ids: (B, S) int; emb_table: (V, D) f32; pe_full: (max_len, D) f32."""
    B, S = ids.shape
    V, D = emb_table.shape
    assert pe_full.shape[0] >= S and pe_full.shape[1] == D

    rows = _pick_seq_chunk(S, max_seq_chunk)
    nj = S // rows
    grid = (nj, B)                                    # pe index constant over b
    pe_slab = pe_full[:S].astype(jnp.float32)         # matches pe[:, :x.size(1)]
    ids_flat = ids.astype(jnp.int32).reshape(-1)      # 1-D SMEM (pow2 padding)
    emb_f32 = emb_table.astype(jnp.float32)

    blk_bytes = rows * D * 4
    table_bytes = V * D * 4
    # Conservative footprint: 2x table (pipeline may double-buffer it even with
    # a constant index map) + 2x pe + 2x out + gathered scratch.
    fast_need = 2 * table_bytes + 4 * blk_bytes + blk_bytes
    use_fast = fast_need <= vmem_budget_bytes

    pe_spec = pl.BlockSpec((rows, D), lambda j, b, ids: (j, 0))
    out_spec = pl.BlockSpec((1, rows, D), lambda j, b, ids: (b, j, 0))
    out_shape = jax.ShapeDtypeStruct((B, S, D), jnp.float32)

    if use_fast:
        grid_spec = pltpu.PrefetchScalarGridSpec(
            num_scalar_prefetch=1,                     # ids -> SMEM
            grid=grid,
            in_specs=[
                pl.BlockSpec((V, D), lambda j, b, ids: (0, 0)),  # table resident
                pe_spec,
            ],
            out_specs=out_spec,
            scratch_shapes=[pltpu.VMEM((rows, D), jnp.float32)],
        )
        kernel = _vmem_gather_kernel
        # Independent steps -> both axes parallel (v7x 2-TC sharding).
        dim_sem = ("parallel", "parallel")
        vmem_limit = max(fast_need + (2 << 20), 16 << 20)
    else:
        assert V >= rows, "HBM-gather path assumes vocab >= rows per chunk"
        grid_spec = pltpu.PrefetchScalarGridSpec(
            num_scalar_prefetch=1,
            grid=grid,
            in_specs=[
                pl.BlockSpec(memory_space=pl.ANY),     # table stays in HBM
                pe_spec,
            ],
            out_specs=out_spec,
            scratch_shapes=[
                pltpu.VMEM((2, rows, D), jnp.float32),   # double-buffered gather
                pltpu.SemaphoreType.DMA((2,)),           # one sem per slot
            ],
        )
        kernel = _hbm_gather_kernel
        # Cross-step double-buffer state -> steps must run sequentially.
        dim_sem = ("arbitrary", "arbitrary")
        vmem_limit = max(7 * blk_bytes + (2 << 20), 16 << 20)

    return pl.pallas_call(
        kernel,
        out_shape=out_shape,
        grid_spec=grid_spec,
        compiler_params=pltpu.CompilerParams(
            dimension_semantics=dim_sem,
            vmem_limit_bytes=int(vmem_limit)),
    )(ids_flat, emb_f32, pe_slab)


if __name__ == "__main__":
    # Small shapes consistent with the module (lane-aligned emb_dim).
    B, S = 2, 8                 # batch, sequence length
    V, D = 64, 128              # n_embeddings, emb_dim
    MAX_LEN = 16                # max_seq_len for the PE buffer

    key = jax.random.PRNGKey(0)
    k_ids, k_emb = jax.random.split(key)

    ids = jax.random.randint(k_ids, (B, S), 0, V, dtype=jnp.int32)
    emb_table = jax.random.normal(k_emb, (V, D), dtype=jnp.float32)
    pe_full = make_positional_encoding(MAX_LEN, D)

    out = text_embedder(ids, emb_table, pe_full)
    out = jax.block_until_ready(out)

    # Pure-JAX reference: token_embedding(x) + pe[:, :S]  (dropout = identity)
    ref = emb_table[ids] + pe_full[:S][None, :, :]
    assert out.shape == (B, S, D)
    assert jnp.allclose(out, ref, atol=1e-5, rtol=1e-5), "mismatch vs reference"

    print("KERNEL_OK")
</pallas_src>

<mosaic_0001>
module attributes {stable_mosaic.version = 11 : i64} {
  func.func @_vmem_gather_kernel(%arg0: i32, %arg1: i32, %arg2: memref<16xi32, #tpu.memory_space<smem>>, %arg3: memref<64x128xf32, #tpu.memory_space<vmem>>, %arg4: memref<8x128xf32, #tpu.memory_space<vmem>>, %arg5: memref<1x8x128xf32, #tpu.memory_space<vmem>>, %arg6: memref<8x128xf32, #tpu.memory_space<vmem>>) attributes {dimension_semantics = [#tpu.dimension_semantics<parallel>, #tpu.dimension_semantics<parallel>], iteration_bounds = array<i64: 1, 2>, scalar_prefetch = 1 : i64, scratch_operands = 1 : i64, tpu.core_type = #tpu.core_type<tc>, window_params = [{pipeline_mode = #tpu.pipeline_mode<synchronous>, transform_indices = @transform_0, window_bounds = array<i64: 64, 128>}, {transform_indices = @transform_1, window_bounds = array<i64: 8, 128>}, {transform_indices = @transform_2, window_bounds = array<i64: 1, 8, 128>}]} {
    %c8_i32 = arith.constant 8 : i32
    %0 = arith.muli %arg1, %c8_i32 : i32
    %c8_i32_0 = arith.constant 8 : i32
    %1 = arith.muli %arg0, %c8_i32_0 : i32
    %2 = arith.addi %0, %1 : i32
    %c0_i32 = arith.constant 0 : i32
    %3 = arith.addi %2, %c0_i32 : i32
    %4 = arith.index_cast %3 : i32 to index
    %5 = memref.load %arg2[%4] : memref<16xi32, #tpu.memory_space<smem>>
    %c0_i32_1 = arith.constant 0 : i32
    %c63_i32 = arith.constant 63 : i32
    %6 = arith.maxsi %c0_i32_1, %5 : i32
    %7 = arith.minsi %c63_i32, %6 : i32
    %8 = arith.index_cast %7 : i32 to index
    %c0 = arith.constant 0 : index
    %9 = vector.load %arg3[%8, %c0] : memref<64x128xf32, #tpu.memory_space<vmem>>, vector<1x128xf32>
    %c0_2 = arith.constant 0 : index
    %c0_3 = arith.constant 0 : index
    %10 = vector.load %arg6[%c0_2, %c0_3] : memref<8x128xf32, #tpu.memory_space<vmem>>, vector<1x128xf32>
    tpu.vector_store %arg6[%c0_2, %c0_3], %9 {strides = array<i32>} : memref<8x128xf32, #tpu.memory_space<vmem>>, vector<1x128xf32>,
    %c1_i32 = arith.constant 1 : i32
    %11 = arith.addi %2, %c1_i32 : i32
    %12 = arith.index_cast %11 : i32 to index
    %13 = memref.load %arg2[%12] : memref<16xi32, #tpu.memory_space<smem>>
    %c0_i32_4 = arith.constant 0 : i32
    %c63_i32_5 = arith.constant 63 : i32
    %14 = arith.maxsi %c0_i32_4, %13 : i32
    %15 = arith.minsi %c63_i32_5, %14 : i32
    %16 = arith.index_cast %15 : i32 to index
    %c0_6 = arith.constant 0 : index
    %17 = vector.load %arg3[%16, %c0_6] : memref<64x128xf32, #tpu.memory_space<vmem>>, vector<1x128xf32>
    %c1 = arith.constant 1 : index
    %c0_7 = arith.constant 0 : index
    %18 = vector.load %arg6[%c1, %c0_7] : memref<8x128xf32, #tpu.memory_space<vmem>>, vector<1x128xf32>
    tpu.vector_store %arg6[%c1, %c0_7], %17 {strides = array<i32>} : memref<8x128xf32, #tpu.memory_space<vmem>>, vector<1x128xf32>,
    %c2_i32 = arith.constant 2 : i32
    %19 = arith.addi %2, %c2_i32 : i32
    %20 = arith.index_cast %19 : i32 to index
    %21 = memref.load %arg2[%20] : memref<16xi32, #tpu.memory_space<smem>>
    %c0_i32_8 = arith.constant 0 : i32
    %c63_i32_9 = arith.constant 63 : i32
    %22 = arith.maxsi %c0_i32_8, %21 : i32
    %23 = arith.minsi %c63_i32_9, %22 : i32
    %24 = arith.index_cast %23 : i32 to index
    %c0_10 = arith.constant 0 : index
    %25 = vector.load %arg3[%24, %c0_10] : memref<64x128xf32, #tpu.memory_space<vmem>>, vector<1x128xf32>
    %c2 = arith.constant 2 : index
    %c0_11 = arith.constant 0 : index
    %26 = vector.load %arg6[%c2, %c0_11] : memref<8x128xf32, #tpu.memory_space<vmem>>, vector<1x128xf32>
    tpu.vector_store %arg6[%c2, %c0_11], %25 {strides = array<i32>} : memref<8x128xf32, #tpu.memory_space<vmem>>, vector<1x128xf32>,
    %c3_i32 = arith.constant 3 : i32
    %27 = arith.addi %2, %c3_i32 : i32
    %28 = arith.index_cast %27 : i32 to index
    %29 = memref.load %arg2[%28] : memref<16xi32, #tpu.memory_space<smem>>
    %c0_i32_12 = arith.constant 0 : i32
    %c63_i32_13 = arith.constant 63 : i32
    %30 = arith.maxsi %c0_i32_12, %29 : i32
    %31 = arith.minsi %c63_i32_13, %30 : i32
    %32 = arith.index_cast %31 : i32 to index
    %c0_14 = arith.constant 0 : index
    %33 = vector.load %arg3[%32, %c0_14] : memref<64x128xf32, #tpu.memory_space<vmem>>, vector<1x128xf32>
    %c3 = arith.constant 3 : index
    %c0_15 = arith.constant 0 : index
    %34 = vector.load %arg6[%c3, %c0_15] : memref<8x128xf32, #tpu.memory_space<vmem>>, vector<1x128xf32>
    tpu.vector_store %arg6[%c3, %c0_15], %33 {strides = array<i32>} : memref<8x128xf32, #tpu.memory_space<vmem>>, vector<1x128xf32>,
    %c4_i32 = arith.constant 4 : i32
    %35 = arith.addi %2, %c4_i32 : i32
    %36 = arith.index_cast %35 : i32 to index
    %37 = memref.load %arg2[%36] : memref<16xi32, #tpu.memory_space<smem>>
    %c0_i32_16 = arith.constant 0 : i32
    %c63_i32_17 = arith.constant 63 : i32
    %38 = arith.maxsi %c0_i32_16, %37 : i32
    %39 = arith.minsi %c63_i32_17, %38 : i32
    %40 = arith.index_cast %39 : i32 to index
    %c0_18 = arith.constant 0 : index
    %41 = vector.load %arg3[%40, %c0_18] : memref<64x128xf32, #tpu.memory_space<vmem>>, vector<1x128xf32>
    %c4 = arith.constant 4 : index
    %c0_19 = arith.constant 0 : index
    %42 = vector.load %arg6[%c4, %c0_19] : memref<8x128xf32, #tpu.memory_space<vmem>>, vector<1x128xf32>
    tpu.vector_store %arg6[%c4, %c0_19], %41 {strides = array<i32>} : memref<8x128xf32, #tpu.memory_space<vmem>>, vector<1x128xf32>,
    %c5_i32 = arith.constant 5 : i32
    %43 = arith.addi %2, %c5_i32 : i32
    %44 = arith.index_cast %43 : i32 to index
    %45 = memref.load %arg2[%44] : memref<16xi32, #tpu.memory_space<smem>>
    %c0_i32_20 = arith.constant 0 : i32
    %c63_i32_21 = arith.constant 63 : i32
    %46 = arith.maxsi %c0_i32_20, %45 : i32
    %47 = arith.minsi %c63_i32_21, %46 : i32
    %48 = arith.index_cast %47 : i32 to index
    %c0_22 = arith.constant 0 : index
    %49 = vector.load %arg3[%48, %c0_22] : memref<64x128xf32, #tpu.memory_space<vmem>>, vector<1x128xf32>
    %c5 = arith.constant 5 : index
    %c0_23 = arith.constant 0 : index
    %50 = vector.load %arg6[%c5, %c0_23] : memref<8x128xf32, #tpu.memory_space<vmem>>, vector<1x128xf32>
    tpu.vector_store %arg6[%c5, %c0_23], %49 {strides = array<i32>} : memref<8x128xf32, #tpu.memory_space<vmem>>, vector<1x128xf32>,
    %c6_i32 = arith.constant 6 : i32
    %51 = arith.addi %2, %c6_i32 : i32
    %52 = arith.index_cast %51 : i32 to index
    %53 = memref.load %arg2[%52] : memref<16xi32, #tpu.memory_space<smem>>
    %c0_i32_24 = arith.constant 0 : i32
    %c63_i32_25 = arith.constant 63 : i32
    %54 = arith.maxsi %c0_i32_24, %53 : i32
    %55 = arith.minsi %c63_i32_25, %54 : i32
    %56 = arith.index_cast %55 : i32 to index
    %c0_26 = arith.constant 0 : index
    %57 = vector.load %arg3[%56, %c0_26] : memref<64x128xf32, #tpu.memory_space<vmem>>, vector<1x128xf32>
    %c6 = arith.constant 6 : index
    %c0_27 = arith.constant 0 : index
    %58 = vector.load %arg6[%c6, %c0_27] : memref<8x128xf32, #tpu.memory_space<vmem>>, vector<1x128xf32>
    tpu.vector_store %arg6[%c6, %c0_27], %57 {strides = array<i32>} : memref<8x128xf32, #tpu.memory_space<vmem>>, vector<1x128xf32>,
    %c7_i32 = arith.constant 7 : i32
    %59 = arith.addi %2, %c7_i32 : i32
    %60 = arith.index_cast %59 : i32 to index
    %61 = memref.load %arg2[%60] : memref<16xi32, #tpu.memory_space<smem>>
    %c0_i32_28 = arith.constant 0 : i32
    %c63_i32_29 = arith.constant 63 : i32
    %62 = arith.maxsi %c0_i32_28, %61 : i32
    %63 = arith.minsi %c63_i32_29, %62 : i32
    %64 = arith.index_cast %63 : i32 to index
    %c0_30 = arith.constant 0 : index
    %65 = vector.load %arg3[%64, %c0_30] : memref<64x128xf32, #tpu.memory_space<vmem>>, vector<1x128xf32>
    %c7 = arith.constant 7 : index
    %c0_31 = arith.constant 0 : index
    %66 = vector.load %arg6[%c7, %c0_31] : memref<8x128xf32, #tpu.memory_space<vmem>>, vector<1x128xf32>
    tpu.vector_store %arg6[%c7, %c0_31], %65 {strides = array<i32>} : memref<8x128xf32, #tpu.memory_space<vmem>>, vector<1x128xf32>,
    %c0_32 = arith.constant 0 : index
    %c0_33 = arith.constant 0 : index
    %67 = vector.load %arg6[%c0_32, %c0_33] : memref<8x128xf32, #tpu.memory_space<vmem>>, vector<8x128xf32>
    %c0_34 = arith.constant 0 : index
    %c0_35 = arith.constant 0 : index
    %68 = vector.load %arg4[%c0_34, %c0_35] : memref<8x128xf32, #tpu.memory_space<vmem>>, vector<8x128xf32>
    %69 = arith.addf %67, %68 : vector<8x128xf32>
    %c0_36 = arith.constant 0 : index
    %c0_37 = arith.constant 0 : index
    %c0_38 = arith.constant 0 : index
    %70 = vector.load %arg5[%c0_36, %c0_37, %c0_38] : memref<1x8x128xf32, #tpu.memory_space<vmem>>, vector<1x8x128xf32>
    %71 = vector.shape_cast %70 : vector<1x8x128xf32> to vector<8x128xf32>
    %72 = vector.shape_cast %69 : vector<8x128xf32> to vector<1x8x128xf32>
    tpu.vector_store %arg5[%c0_36, %c0_37, %c0_38], %72 {strides = array<i32>} : memref<1x8x128xf32, #tpu.memory_space<vmem>>, vector<1x8x128xf32>,
    return
  }
  func.func @transform_0(%arg0: i32, %arg1: i32, %arg2: memref<16xi32, #tpu.memory_space<smem>>) -> (i32, i32) {
    %c0_i32 = arith.constant 0 : i32
    %c0_i32_0 = arith.constant 0 : i32
    %c0_i32_1 = arith.constant 0 : i32
    return %c0_i32, %c0_i32_0 : i32, i32
  }
  func.func @transform_1(%arg0: i32, %arg1: i32, %arg2: memref<16xi32, #tpu.memory_space<smem>>) -> (i32, i32) {
    %c0_i32 = arith.constant 0 : i32
    %c0_i32_0 = arith.constant 0 : i32
    return %arg0, %c0_i32 : i32, i32
  }
  func.func @transform_2(%arg0: i32, %arg1: i32, %arg2: memref<16xi32, #tpu.memory_space<smem>>) -> (i32, i32, i32) {
    %c0_i32 = arith.constant 0 : i32
    %c0_i32_0 = arith.constant 0 : i32
    return %arg1, %arg0, %c0_i32 : i32, i32, i32
  }
}

</mosaic_0001>

<bundles_post_ra>
// kernel: tpu_custom_call.1
= control target key start
LH: loop header
LB: loop body
LE: loop exit
PB: predicated region body
PF: predicated region fallthrough
CT: control target
= control target key end

     0   :  { %s910_s0 = inlined_call_operand.hbm [shape: s32[16], index: 0, kind: input, shape index: {}]   ;;  %s911_s1 = inlined_call_operand.hbm [shape: f32[64,128], index: 1, kind: input, shape index: {}]   ;;  %s912_s2 = inlined_call_operand.hbm [shape: f32[8,128], index: 2, kind: input, shape index: {}]   ;;  %s913_s3 = inlined_call_operand.hbm [shape: f32[2,8,128], index: 3, kind: output, shape index: {}]  }
   0x1   :  { %s506_s14 = scalar_lea.hbm %s910_s0, 16 }
   0x2   :  { %p507_p0 = scmp.ne.s32.totalorder %s910_s0, %s506_s14  ;;  %p510_p1 = scmp.lt.u32.totalorder %s506_s14, %s910_s0 }
   0x4   :  { %p512_p2 = pnand %p510_p1, %p507_p0 }
   0x6   :  { %515 = shalt.err (!%p512_p2)  }
   0x7   :  { %s662_s19 = smov [#allocation4]  }
   0x8   :  { %9 = dma.hbm_to_smem %s910_s0, 16, %s662_s19, [#allocation3] }
   0x9   :  { %624 = dma.done.wait [#allocation3], 16 }
   0xa   :  { %625 = vsyncadd [#allocation3], 4294967280 }
   0xb   :  { %11 = sfence }
   0xc   :  { %12 = vsyncpa [#allocation6], 0 }
   0xd   :  { %13 = vsyncpa [#allocation9], 0 }
   0xe   :  { %14 = vsyncpa [#allocation7], 0 }
   0xf   :  { %16 = vsyncpa [#allocation7 + $0x1], 0  ;;  %s700_s22 = smov 0   ;;  %s702_s23 = smov 0  }
  0x10   :  { %s704_s24 = smov 0   ;;  %s706_s25 = smov 0  }
  0x11   :  { %s708_s26 = smov 0   ;;  %s710_s27 = smov 0  }
  0x12 LB: > { %s357_s0 = sadd.s32 4294967295, %s660_s27   ;;  %s358_s28 = sadd.s32 4294967294, %s660_s27   ;;  %s660_s27 = sphi %s710_s27, %s22_s27   ;;  %s656_s26 = sphi %s708_s26, %s931_s26   ;;  %s652_s25 = sphi %s706_s25, %s930_s25   ;;  %s648_s24 = sphi %s704_s24, %s929_s24   ;;  %s644_s23 = sphi %s702_s23, %s928_s23   ;;  %s640_s22 = sphi %s700_s22, %s927_s22  }
  0x13   : > { %s31_s29 = sadd.s32 1, %s656_s26  ;;  %s90_s30 = sadd.s32 1, %s648_s24 }
  0x14   : > { %p32_p3 = scmp.ge.s32.totalorder %s31_s29, 2  ;;  %p100_p4 = scmp.ne.s32.totalorder %s648_s24, %s644_s23 }
  0x15   : > { %p101_p5 = scmp.eq.s32.totalorder %s357_s0, 1  ;;  %p106_p6 = scmp.ne.s32.totalorder %s644_s23, %s640_s22 }
  0x16   : > { %s933_s29 = smov (%p32_p3, %s31_s29), 0  ;;  %p107_p8 = scmp.eq.s32.totalorder %s358_s28, 1 }
  0x17   : > { %p740_p7 = por %p101_p5, %p100_p4  ;;  %s85_s5 = ssub.s32 %s656_s26, %s933_s29 }
  0x18   : > { %p359_p9 = scmp.ge.s32.totalorder %s660_s27, 1  ;;  %p88_p10 = scmp.eq.s32.totalorder %s85_s5, 0 }
  0x19   : > { %s918_s4 = scalar_select %p740_p7, 1, 0 }
  0x1a   : > { %p747_p11 = por %p107_p8, %p106_p6  ;;  %p114_p12 = scmp.lt.s32.totalorder %s660_s27, 3 }
  0x1b   : > { %s753_s7 = scalar_select %p88_p10, %s648_s24, %s90_s30  }
  0x1c   : > { %s919_s6 = scalar_select %p747_p11, 1, 0 }
  0x1d   : > { %p755_p13 = pnand %p359_p9, %p114_p12  ;;  %p759_p0 = scmp.eq.s32.totalorder %s357_s0, 0 }
  0x1e   : > { %s663_s10 = smov [#allocation5]   ;;  %s664_s13 = smov [#allocation8]  }
  0x1f   : > { %s920_s8 = scalar_select %p755_p13, 1, 0 }
  0x20   : > { %s921_s9 = scalar_select %p759_p0, 1, 0 }
  0x21   : > { %p437_p1 = pneg %p755_p13  ;;  %s126_s11 = sshll.u32 %s663_s10, 4  ;;  %s127_s11 = int_to_ptr.vmem [resolvable:$true] %s126_s11 }
  0x22   : > { %s142_s14 = sshll.u32 %s664_s13, 4  ;;  %s516_s17 = scalar_lea.hbm %s911_s1, 1024  ;;  %s771_s14 = int_to_ptr.vmem [resolvable:$true] %s142_s14 }
  0x23   : > { %p767_p2 = pnand %p759_p0, %p437_p1  ;;  %p517_p3 = scmp.ne.s32.totalorder %s911_s1, %s516_s17 }
  0x24   : > { %p523_p8 = scmp.lt.u32.totalorder %s516_s17, %s911_s1 }
  0x25   : > { %p518_p4 = pneg %p767_p2 }
  0x27   : > { %p519_p5 = pnand %p518_p4, %p517_p3 }
  0x29   : > { %p520_p6 = pneg %p519_p5 }
  0x2b   : > { %p525_p9 = pnand %p523_p8, %p520_p6 }
  0x2d   : > { %528 = shalt.err (!%p525_p9)
}
  0x2e   : > { %s529_s0 = scalar_lea.vmem %s127_s11, 1024  ;;  %p537_p11 = scmp.lt.s32.totalorder %s127_s11, %s127_s11 }
  0x2f   : > { %p530_p10 = scmp.ne.s32.totalorder %s127_s11, %s529_s0  ;;  %p538_p7 = scmp.lt.s32.totalorder %s529_s0, %s529_s0 }
  0x31   : > { %p532_p12 = pnand %p530_p10, %p518_p4  ;;  %p539_p0 = por %p538_p7, %p537_p11 }
  0x33   : > { %p533_p1 = pneg %p532_p12 }
  0x35   : > { %p540_p13 = pnand %p539_p0, %p533_p1 }
  0x37   : > { %543 = shalt.err (!%p540_p13)
}
  0x38   : > { %s665_s28 = smov 128   ;;  %s666_s30 = smov 8  }
  0x39   : > { %440 = dma.hbm_to_vmem [thread:$0]  (!%p767_p2), %s911_s1, 1024, %s127_s11, [#allocation6], %s665_s28, %s665_s28, %s666_s30  }
  0x3a   : > { %s544_s16 = scalar_lea.hbm %s912_s2, 128 }
  0x3b   : > { %p545_p3 = scmp.ne.s32.totalorder %s912_s2, %s544_s16  ;;  %p551_p13 = scmp.lt.u32.totalorder %s544_s16, %s912_s2 }
  0x3d   : > { %p547_p7 = pnand %p545_p3, %p518_p4 }
  0x3f   : > { %p548_p11 = pneg %p547_p7 }
  0x41   : > { %p553_p0 = pnand %p551_p13, %p548_p11 }
  0x43   : > { %556 = shalt.err (!%p553_p0)
}
  0x44   : > { %s557_s11 = scalar_lea.vmem %s771_s14, 128  ;;  %p565_p9 = scmp.lt.s32.totalorder %s771_s14, %s771_s14 }
  0x45   : > { %p558_p5 = scmp.ne.s32.totalorder %s771_s14, %s557_s11  ;;  %p566_p10 = scmp.lt.s32.totalorder %s557_s11, %s557_s11 }
  0x47   : > { %p560_p6 = pnand %p558_p5, %p518_p4  ;;  %p567_p12 = por %p566_p10, %p565_p9 }
  0x49   : > { %p561_p8 = pneg %p560_p6 }
  0x4b   : > { %p568_p1 = pnand %p567_p12, %p561_p8 }
  0x4d   : > { %571 = shalt.err (!%p568_p1)
}
  0x4e   : > { %443 = dma.hbm_to_vmem [thread:$0]  (!%p767_p2), %s912_s2, 128, %s771_s14, [#allocation9]  }
  0x4f   : > { %p923_p3 = scmp.ne.s32.totalorder %s920_s8, 0 }
  0x50   : > { %p924_p7 = scmp.ne.s32.totalorder (!%p923_p3), %s921_s9, 0 }
  0x51   : > { %155 = sbr.rel (%p923_p3) target bundleno = 150 (0x96), region = 28 }
  0x58   : > { %627 = dma.done.wait (%p924_p7), [#allocation6], 1024  }
  0x59   : > { %629 = vsyncadd (%p924_p7), [#allocation6], 4294966272 }
  0x5a   : > { %631 = dma.done.wait (%p924_p7), [#allocation9], 128  }
  0x5b   : > { %633 = vsyncadd (%p924_p7), [#allocation9], 4294967168  ;;  %s831_s12 = sshll.u32 %s652_s25, 3  ;;  %v251_v8 = vld [vmem:[#allocation8] sm:$0xff] }
  0x5c   : > { %s179_s8 = sld [smem:[#allocation4 + %s831_s12]]  ;;  %s187_s14 = sadd.s32 1, %s831_s12 }
  0x5d   : > { %s188_s28 = sld [smem:[#allocation4 + %s187_s14]]  ;;  %s196_s30 = sadd.s32 2, %s831_s12 }
  0x5e   : > { %s197_s5 = sld [smem:[#allocation4 + %s196_s30]]  ;;  %s205_s10 = sadd.s32 3, %s831_s12 }
  0x5f   : > { %s837_s13 = sld [smem:[#allocation4 + %s205_s10]]  ;;  %s214_s9 = sadd.s32 4, %s831_s12 }
  0x60   : > { %s840_s15 = sld [smem:[#allocation4 + %s214_s9]]  ;;  %s223_s16 = sadd.s32 5, %s831_s12 }
  0x61   : > { %s843_s17 = sld [smem:[#allocation4 + %s223_s16]]  ;;  %s232_s18 = sadd.s32 6, %s831_s12 }
  0x62   : > { %p180_p2 = scmp.gt.s32.totalorder %s179_s8, 0  ;;  %p367_p4 = scmp.lt.s32.totalorder %s179_s8, 63 }
  0x63   : > { %p189_p11 = scmp.gt.s32.totalorder %s188_s28, 0  ;;  %p372_p13 = scmp.lt.s32.totalorder %s188_s28, 63 }
  0x64   : > { %s935_s8 = smov (!%p180_p2, %s179_s8), 0  ;;  %p198_p0 = scmp.gt.s32.totalorder %s197_s5, 0 }
  0x65   : > { %s937_s28 = smov (!%p189_p11, %s188_s28), 0  ;;  %s939_s8 = smov (!%p367_p4, %s935_s8), 63 }
  0x66   : > { %s941_s28 = smov (!%p372_p13, %s937_s28), 63  ;;  %s184_s19 = scalar_lea.vmem [#allocation5], %s939_s8 }
  0x67   : > { %v185_v0 = vld [vmem:[%s184_s19] sm:$0x1]  ;;  %p377_p5 = scmp.lt.s32.totalorder %s197_s5, 63  ;;  %s193_s20 = scalar_lea.vmem [#allocation5], %s941_s28 }
  0x68   : > { %186 = vst [vmem:[#allocation2] sm:$0x1] %v185_v0  ;;  %v194_v1 = vld [vmem:[%s193_s20] sm:$0x1]  ;;  %s943_s5 = smov (!%p198_p0, %s197_s5), 0  ;;  %p207_p6 = scmp.gt.s32.totalorder %s837_s13, 0 }
  0x69   : > { %195 = vst [vmem:[#allocation2 + $0x1] sm:$0x1] %v194_v1  ;;  %p382_p8 = scmp.lt.s32.totalorder %s837_s13, 63  ;;  %s945_s5 = smov (!%p377_p5, %s943_s5), 63 }
  0x6a   : > { %s947_s13 = smov (!%p207_p6, %s837_s13), 0  ;;  %p216_p9 = scmp.gt.s32.totalorder %s840_s15, 0 }
  0x6b   : > { %s202_s11 = scalar_lea.vmem [#allocation5], %s945_s5  ;;  %s949_s13 = smov (!%p382_p8, %s947_s13), 63 }
  0x6c   : > { %v203_v2 = vld [vmem:[%s202_s11] sm:$0x1]  ;;  %s217_s21 = scalar_select %p216_p9, %s840_s15, 0 }
  0x6d   : > { %204 = vst [vmem:[#allocation2 + $0x2] sm:$0x1] %v203_v2  ;;  %p387_p10 = scmp.lt.s32.totalorder %s840_s15, 63  ;;  %s211_s0 = scalar_lea.vmem [#allocation5], %s949_s13 }
  0x6e   : > { %v212_v3 = vld [vmem:[%s211_s0] sm:$0x1]  ;;  %p225_p12 = scmp.gt.s32.totalorder %s843_s17, 0  ;;  %p392_p1 = scmp.lt.s32.totalorder %s843_s17, 63 }
  0x6f   : > { %213 = vst [vmem:[#allocation2 + $0x3] sm:$0x1] %v212_v3  ;;  %s951_s21 = smov (!%p387_p10, %s217_s21), 63  ;;  %s233_s8 = sld [smem:[#allocation4 + %s232_s18]] }
  0x70   : > { %s953_s17 = smov (!%p225_p12, %s843_s17), 0  ;;  %s220_s14 = scalar_lea.vmem [#allocation5], %s951_s21 }
  0x71   : > { %v221_v4 = vld [vmem:[%s220_s14] sm:$0x1]  ;;  %s955_s17 = smov (!%p392_p1, %s953_s17), 63  ;;  %s241_s28 = sadd.s32 7, %s831_s12 }
  0x72   : > { %222 = vst [vmem:[#allocation2 + $0x4] sm:$0x1] %v221_v4  ;;  %s242_s30 = sld [smem:[#allocation4 + %s241_s28]]  ;;  %s229_s5 = scalar_lea.vmem [#allocation5], %s955_s17 }
  0x73   : > { %v230_v5 = vld [vmem:[%s229_s5] sm:$0x1]  ;;  %s173_s10 = sand.u32 1, %s644_s23   ;;  %s408_s17 = sshll.u32 %s652_s25, 7 }
  0x74   : > { %231 = vst [vmem:[#allocation2 + $0x5] sm:$0x1] %v230_v5  ;;  %s365_s12 = sshll.u32 %s173_s10, 3  ;;  %s865_s20 = scalar_lea.hbm %s913_s3, %s408_s17 }
  0x75   : > { %p234_p3 = scmp.gt.s32.totalorder %s233_s8, 0  ;;  %p397_p7 = scmp.lt.s32.totalorder %s233_s8, 63 }
  0x76   : > { %s175_s15 = scalar_lea.vmem [#allocation10], %s365_s12  ;;  %s255_s11 = scalar_lea.sflag [#allocation7], %s173_s10 }
  0x77   : > { %s957_s8 = smov (!%p234_p3, %s233_s8), 0  ;;  %s269_s16 = sshll.u32 %s175_s15, 4  ;;  %s860_s16 = int_to_ptr.vmem [resolvable:$true] %s269_s16 }
  0x78   : > { %p243_p2 = scmp.gt.s32.totalorder %s242_s30, 0  ;;  %p402_p4 = scmp.lt.s32.totalorder %s242_s30, 63 }
  0x79   : > { %s959_s8 = smov (!%p397_p7, %s957_s8), 63  ;;  %s572_s21 = scalar_lea.vmem %s860_s16, 128 }
  0x7a   : > { %s961_s30 = smov (!%p243_p2, %s242_s30), 0  ;;  %s238_s13 = scalar_lea.vmem [#allocation5], %s959_s8 }
  0x7b   : > { %v239_v6 = vld [vmem:[%s238_s13] sm:$0x1]  ;;  %s963_s30 = smov (!%p402_p4, %s961_s30), 63  ;;  %p573_p11 = scmp.ne.s32.totalorder %s860_s16, %s572_s21 }
  0x7c   : > { %240 = vst [vmem:[#allocation2 + $0x6] sm:$0x1] %v239_v6  ;;  %s247_s9 = scalar_lea.vmem [#allocation5], %s963_s30  ;;  %p925_p13 = scmp.ne.s32.totalorder %s918_s4, 0 }
  0x7d   : > { %v248_v7 = vld [vmem:[%s247_s9] sm:$0x1]  ;;  %s667_s25 = smov [#allocation10]  }
  0x7e   : > { %249 = vst [vmem:[#allocation2 + $0x7] sm:$0x1] %v248_v7  ;;  %p574_p0 = pnand %p573_p11, %p925_p13  ;;  %s576_s0 = sshll.u32 %s667_s25, 4  ;;  %s577_s0 = int_to_ptr.vmem [resolvable:$false] %s576_s0 }
  0x7f   : > { %s578_s8 = scalar_lea.vmem %s577_s0, 256  ;;  %p579_p6 = scmp.lt.s32.totalorder %s860_s16, %s577_s0 }
  0x80   : > { %p575_p5 = pneg %p574_p0  ;;  %p580_p8 = scmp.lt.s32.totalorder %s578_s8, %s572_s21 }
  0x82   : > { %p581_p9 = por %p580_p8, %p579_p6 }
  0x84   : > { %p582_p10 = pnand %p581_p9, %p575_p5 }
  0x85   : > { %v250_v9 = vld [vmem:[#allocation2] sm:$0xff] }
  0x86   : > { %v252_v10 = vadd.f32 %v251_v8, %v250_v9 }
  0x88   : > { %253 = vst [vmem:[%s175_s15] sm:$0xff] %v252_v10 }
  0x89   : > { %585 = shalt.err (!%p582_p10)
}
  0x8a   : > { %s586_s14 = scalar_lea.hbm %s865_s20, 128  ;;  %s590_s5 = scalar_lea.hbm %s913_s3, 256 }
  0x8b   : > { %p587_p12 = scmp.ne.s32.totalorder %s865_s20, %s586_s14  ;;  %p591_p7 = scmp.lt.u32.totalorder %s865_s20, %s913_s3 }
  0x8c   : > { %p592_p2 = scmp.lt.u32.totalorder %s590_s5, %s586_s14  ;;  %p594_p11 = scmp.lt.u32.totalorder %s586_s14, %s865_s20 }
  0x8d   : > { %p588_p1 = pnand %p587_p12, %p925_p13 }
  0x8e   : > { %p593_p4 = por %p592_p2, %p591_p7 }
  0x8f   : > { %p589_p3 = pneg %p588_p1 }
  0x90   : > { %p595_p0 = por %p594_p11, %p593_p4 }
  0x92   : > { %p596_p5 = pnand %p595_p0, %p589_p3 }
  0x94   : > { %599 = shalt.err (!%p596_p5)
}
  0x95   : > { %435 = dma.vmem_to_hbm [thread:$0]  (%p925_p13), %s860_s16, 128, %s865_s20, %s255_s11  }
  0x96 PF: > { %p452_p6 = scmp.ge.s32.totalorder %s660_s27, 2  ;;  %s281_s9 = sand.u32 1, %s640_s22  }
  0x97   : > { %p926_p8 = scmp.ne.s32.totalorder %s919_s6, 0  ;;  %s282_s12 = scalar_lea.sflag [#allocation7], %s281_s9 }
  0x99   : > { %p445_p9 = pnand %p452_p6, %p926_p8 }
  0x9b   : > { %635 = dma.done.wait (!%p445_p9), %s282_s12, 128  }
  0x9c   : > { %637 = vsyncadd (!%p445_p9), %s282_s12, 4294967168  ;;  %s22_s27 = sadd.s32 1, %s660_s27   ;;  %s927_s22 = smov %s644_s23 }
  0x9d   : > { %p19_p10 = scmp.ge.s32.totalorder %s22_s27, 4   ;;  %s928_s23 = smov %s648_s24 }
  0x9e   : > { %s929_s24 = smov %s753_s7  ;;  %s930_s25 = smov %s656_s26 }
  0x9f   : > { %s931_s26 = smov %s933_s29  ;;  %21 = sbr.rel (!%p19_p10) target bundleno = 18 (0x12), region = 78 }
  0xa6   :  { %287 = vsyncpa [#allocation6], 1 }
  0xa7   :  { %289 = vsyncpa [#allocation6 + $0x1], 1 }
  0xa8   :  { %290 = vsyncpa [#allocation9], 1 }
  0xa9   :  { %291 = vsyncpa [#allocation7], 1 }
  0xaa   :  { %293 = vsyncpa [#allocation7 + $0x1], 1 }

</bundles_post_ra>
